<compile_context>
chip_gen: v7x
topology: tpu7x:2x2x1
jax: 0.10.0
libtpu: 0.0.40
codegen_flags: <defaults>
</compile_context>

<pallas_src>
import functools
import math

import jax
import jax.numpy as jnp
from jax.experimental import pallas as pl
from jax.experimental.pallas import tpu as pltpu

_DEFAULT_MU = 0.707107
_DEFAULT_SIGMA = 0.282095

_LANE = 128
# Candidate slab widths: multiples of 128 -> unmasked full-lane stores; since a
# block is whole rows of a contiguous slab, per-block DMA is one contiguous
# chunk for every candidate, so width only affects grid granularity.
_WIDTH_CANDIDATES = (16384, 8192, 4096, 2048, 1024, 512, 256, 128)
# >= 4 grid steps when the data allows: double-buffer overlap needs >= 2 steps
# per TensorCore and v7x shards the "parallel" axis across its 2 TCs.
_MIN_GRID_STEPS = 4

# erf(z) ~= tanh(_TANH_C1 * z + _TANH_C2 * z**3)  (max abs error ~3e-4)
_TANH_C1 = 2.0 / math.sqrt(math.pi)                                   # 1.1283791671
_TANH_C2 = 0.044715 * 2.0 * math.sqrt(2.0) * math.sqrt(2.0 / math.pi)  # 0.1009109


def _cdiv(a: int, b: int) -> int:
    return -(-a // b)


def _round_up(a: int, m: int) -> int:
    return _cdiv(a, m) * m


def _sublane_multiple(dtype) -> int:
    # Sub-32-bit dtypes pack along sublanes: bf16 -> 16 rows, 8-bit -> 32 rows.
    return max(8, 32 // jnp.dtype(dtype).itemsize)


@functools.lru_cache(maxsize=None)
def _block_budget():
    """(per-array block byte target, vmem_limit_bytes) gated on VMEM capacity."""
    try:
        cap = int(pltpu.get_tpu_info().vmem_capacity_bytes)
    except Exception:  # unknown backend / interpret mode
        cap = 0
    mib = 1024 * 1024
    if cap >= 96 * mib:
        # v5e / v6e: 128 MiB physical VMEM.  8 MiB blocks -> 32 MiB of
        # double-buffered in/out windows; 96 MiB explicit scoped limit leaves
        # plenty of headroom for elementwise temporaries.
        return 8 * mib, 96 * mib
    if cap > 0:
        # v7x: only 64 MiB physical per TensorCore -> re-derived tiling:
        # 4 MiB blocks (16 MiB of windows) under a 48 MiB explicit limit.
        return 4 * mib, 48 * mib
    # Unknown chip: stay under every generation's default scoped VMEM limit.
    return 2 * mib, None


def _make_kernel(mu: float, inv: float, exact: bool):
    def kernel(x_ref, o_ref):
        z = (x_ref[...].astype(jnp.float32) - mu) * inv
        if exact:
            # f32 outputs: exact erf (same numerics as torch.erf / lax.erf).
            e = jax.lax.erf(z)
        else:
            # Sub-f32 outputs: EUP-offloaded erf.  One tanh on the EUP slot
            # plus ~6 VALU ops instead of erf's ~30-op VPU polynomial; the
            # ~3e-4 max error is far below one bf16 ULP of the result.
            # TODO(synk): on parts with a bf16 VPU (v6e/v7x) this could run
            # natively in bf16 for another ~2x packed-VALU throughput.
            e = jnp.tanh(z * (_TANH_C1 + _TANH_C2 * (z * z)))
        o_ref[...] = (0.5 * (1.0 + e)).astype(o_ref.dtype)

    return kernel


def _pick_width(n: int, sub: int) -> int:
    # Prefer the widest slab that still leaves enough rows for >= 4 sublane-
    # aligned grid steps (what enables DMA/compute overlap + 2-TC sharding).
    for w in _WIDTH_CANDIDATES:
        if n % w == 0 and n // w >= _MIN_GRID_STEPS * sub:
            return w
    # Small input: a single (or few) block launch is fine -> widest divisor.
    for w in _WIDTH_CANDIDATES:
        if n % w == 0:
            return w
    raise ValueError("numel must be a multiple of 128 on this path")


def _run_tiled(x2d: jax.Array, mu: float, inv: float) -> jax.Array:
    rows, width = x2d.shape
    dtype = x2d.dtype
    itemsize = jnp.dtype(dtype).itemsize
    sub = _sublane_multiple(dtype)
    block_bytes, vmem_limit = _block_budget()

    # f32 (and wider) -> exact erf; bf16/f16 -> EUP tanh-erf.
    exact = itemsize >= 4

    # Largest sublane-aligned row tile under the per-generation block target.
    rows_fit = max(1, block_bytes // (width * itemsize))
    max_tile = max(sub, (rows_fit // sub) * sub)

    if rows <= 2 * sub and rows <= max_tile:
        tile_rows = rows  # tiny input: one full-extent block (always legal)
    else:
        steps = _cdiv(rows, max_tile)
        if rows >= _MIN_GRID_STEPS * sub:
            steps = max(steps, _MIN_GRID_STEPS)  # >= 2 pipelined steps per v7x TC
        if steps > 1 and steps % 2:
            steps += 1                           # even split across the 2 v7x TCs
        # Balanced, sublane-aligned tile so the ragged tail isn't pathological.
        tile_rows = min(max_tile, max(sub, _round_up(_cdiv(rows, steps), sub)))
        if tile_rows >= rows:
            tile_rows = rows
    grid = (_cdiv(rows, tile_rows),)

    compiler_kwargs = dict(dimension_semantics=("parallel",))
    if vmem_limit is not None:
        compiler_kwargs["vmem_limit_bytes"] = vmem_limit

    return pl.pallas_call(
        _make_kernel(mu, inv, exact),
        out_shape=jax.ShapeDtypeStruct((rows, width), dtype),
        grid_spec=pltpu.PrefetchScalarGridSpec(
            num_scalar_prefetch=0,
            grid=grid,
            in_specs=[pl.BlockSpec((tile_rows, width), lambda i: (i, 0))],
            out_specs=pl.BlockSpec((tile_rows, width), lambda i: (i, 0)),
        ),
        compiler_params=pltpu.CompilerParams(**compiler_kwargs),
    )(x2d)


def _laplace_jnp(x: jax.Array, mu: float, inv: float) -> jax.Array:
    z = (x.astype(jnp.float32) - mu) * inv
    return (0.5 * (1.0 + jax.lax.erf(z))).astype(x.dtype)


def laplace_activation(x: jax.Array,
                       mu: float = _DEFAULT_MU,
                       sigma: float = _DEFAULT_SIGMA) -> jax.Array:
    """Elementwise Laplace activation: 0.5 * (1 + erf((x - mu) / (sigma*sqrt(2))))."""
    orig_shape = x.shape
    n = x.size
    if n == 0:
        return x
    inv = 1.0 / (sigma * math.sqrt(2.0))
    sub = _sublane_multiple(x.dtype)

    if n % _LANE == 0:
        # Fast path: reshape of a contiguous array is free, so the only HBM
        # traffic is the kernel's own read + write.
        width = _pick_width(n, sub)
        out2d = _run_tiled(jnp.reshape(x, (n // width, width)), mu, inv)
        return jnp.reshape(out2d, orig_shape)

    # Ragged numel: bulk/tail split (no full-array pad + post-slice passes).
    flat = jnp.reshape(x, (n,))
    n_bulk = (n // _LANE) * _LANE
    tail_out = _laplace_jnp(flat[n_bulk:], mu, inv)  # < 128 elements: plain jnp
    if n_bulk == 0:
        return jnp.reshape(tail_out, orig_shape)
    width = _pick_width(n_bulk, sub)
    bulk2d = _run_tiled(jnp.reshape(flat[:n_bulk], (n_bulk // width, width)), mu, inv)
    # TODO(synk): the concatenate still re-copies the bulk once; a masked final
    # block (pltpu.store with a lane mask) would make ragged inputs one pass.
    out = jnp.concatenate([jnp.reshape(bulk2d, (n_bulk,)), tail_out])
    return jnp.reshape(out, orig_shape)


def _laplace_ref(x: jax.Array,
                 mu: float = _DEFAULT_MU,
                 sigma: float = _DEFAULT_SIGMA) -> jax.Array:
    inv = 1.0 / (sigma * math.sqrt(2.0))
    z = (x.astype(jnp.float32) - mu) * inv
    return (0.5 * (1.0 + jax.lax.erf(z))).astype(x.dtype)


if __name__ == "__main__":
    key = jax.random.PRNGKey(0)
    k1, k2, k3 = jax.random.split(key, 3)

    # NCHW example (batch=2, channels=4, H=W=16): fast no-pad path.
    x = jax.random.normal(k1, (2, 4, 16, 16), dtype=jnp.float32)
    y = jax.block_until_ready(laplace_activation(x))
    assert y.shape == x.shape and y.dtype == x.dtype
    assert jnp.allclose(y, _laplace_ref(x), atol=1e-6, rtol=1e-6)

    # bf16 input: EUP tanh-erf path (approximation error << bf16 ULP).
    xb = x.astype(jnp.bfloat16)
    yb = jax.block_until_ready(laplace_activation(xb))
    assert yb.shape == xb.shape and yb.dtype == jnp.bfloat16
    assert jnp.allclose(yb.astype(jnp.float32), _laplace_ref(xb).astype(jnp.float32),
                        atol=2e-2, rtol=2e-2)

    # Shape that exercises a multi-step "parallel" grid (>= 4 pipelined blocks).
    xg = jax.random.normal(k2, (64, 256), dtype=jnp.float32)
    yg = jax.block_until_ready(laplace_activation(xg))
    assert jnp.allclose(yg, _laplace_ref(xg), atol=1e-6, rtol=1e-6)

    # Rows not a multiple of the tile: ragged last block (masked boundary writes).
    xm = jax.random.normal(k3, (100, 128), dtype=jnp.float32)
    ym = jax.block_until_ready(laplace_activation(xm))
    assert jnp.allclose(ym, _laplace_ref(xm), atol=1e-6, rtol=1e-6)

    # Ragged numel (not a multiple of 128): bulk/tail split path.
    xr = jax.random.normal(k1, (5, 7, 9), dtype=jnp.float32)
    yr = jax.block_until_ready(laplace_activation(xr))
    assert yr.shape == xr.shape
    assert jnp.allclose(yr, _laplace_ref(xr), atol=1e-6, rtol=1e-6)

    print("KERNEL_OK")
</pallas_src>

<mosaic_0001>
module attributes {stable_mosaic.version = 11 : i64} {
  func.func @kernel(%arg0: i32, %arg1: memref<1x2048xf32, #tpu.memory_space<vmem>>, %arg2: memref<1x2048xf32, #tpu.memory_space<vmem>>) attributes {dimension_semantics = [#tpu.dimension_semantics<parallel>], iteration_bounds = array<i64: 1>, scalar_prefetch = 0 : i64, scratch_operands = 0 : i64, tpu.core_type = #tpu.core_type<tc>, window_params = [{transform_indices = @transform_0, window_bounds = array<i64: 1, 2048>}, {transform_indices = @transform_1, window_bounds = array<i64: 1, 2048>}]} {
    %c0 = arith.constant 0 : index
    %c0_0 = arith.constant 0 : index
    %0 = vector.load %arg1[%c0, %c0_0] : memref<1x2048xf32, #tpu.memory_space<vmem>>, vector<1x2048xf32>
    %cst = arith.constant 7.071070e-01 : f32
    %1 = vector.broadcast %cst : f32 to vector<1x2048xf32>
    %2 = arith.subf %0, %1 : vector<1x2048xf32>
    %cst_1 = arith.constant 2.50662637 : f32
    %3 = vector.broadcast %cst_1 : f32 to vector<1x2048xf32>
    %4 = arith.mulf %2, %3 : vector<1x2048xf32>
    %5 = math.erf %4 : vector<1x2048xf32>
    %cst_2 = arith.constant 1.000000e+00 : f32
    %6 = vector.broadcast %cst_2 : f32 to vector<1x2048xf32>
    %7 = arith.addf %6, %5 : vector<1x2048xf32>
    %cst_3 = arith.constant 5.000000e-01 : f32
    %8 = vector.broadcast %cst_3 : f32 to vector<1x2048xf32>
    %9 = arith.mulf %8, %7 : vector<1x2048xf32>
    %c0_4 = arith.constant 0 : index
    %c0_5 = arith.constant 0 : index
    %10 = vector.load %arg2[%c0_4, %c0_5] : memref<1x2048xf32, #tpu.memory_space<vmem>>, vector<1x2048xf32>
    tpu.vector_store %arg2[%c0_4, %c0_5], %9 {strides = array<i32>} : memref<1x2048xf32, #tpu.memory_space<vmem>>, vector<1x2048xf32>,
    return
  }
  func.func @transform_0(%arg0: i32) -> (i32, i32) {
    %c0_i32 = arith.constant 0 : i32
    %c0_i32_0 = arith.constant 0 : i32
    return %arg0, %c0_i32 : i32, i32
  }
  func.func @transform_1(%arg0: i32) -> (i32, i32) {
    %c0_i32 = arith.constant 0 : i32
    %c0_i32_0 = arith.constant 0 : i32
    return %arg0, %c0_i32 : i32, i32
  }
}

</mosaic_0001>

<bundles_post_ra>
// kernel: tpu_custom_call.1
= control target key start
LH: loop header
LB: loop body
LE: loop exit
PB: predicated region body
PF: predicated region fallthrough
CT: control target
= control target key end

     0   :  { %6 = vsyncpa [#allocation3], 0  ;;  %s142_s0 = inlined_call_operand.hbm [shape: f32[1,2048], index: 0, kind: input, shape index: {}]   ;;  %s143_s1 = inlined_call_operand.hbm [shape: f32[1,2048], index: 1, kind: output, shape index: {}]  }
   0x1   :  { %7 = vsyncpa [#allocation4], 0  ;;  %s106_s6 = smov [#allocation2]   ;;  %s58_s10 = scalar_lea.hbm %s142_s0, 256 }
   0x2   :  { %s14_s7 = sshll.u32 %s106_s6, 4  ;;  %p59_p0 = scmp.ne.s32.totalorder %s142_s0, %s58_s10  ;;  %s15_s7 = int_to_ptr.vmem [resolvable:$true] %s14_s7 }
   0x3   :  { %p62_p1 = scmp.lt.u32.totalorder %s58_s10, %s142_s0 }
   0x5   :  { %p64_p2 = pnand %p62_p1, %p59_p0 }
   0x7   :  { %67 = shalt.err (!%p64_p2)
}
   0x8   :  { %s68_s15 = scalar_lea.vmem %s15_s7, 256  ;;  %p73_p4 = scmp.lt.s32.totalorder %s15_s7, %s15_s7 }
   0x9   :  { %p69_p3 = scmp.ne.s32.totalorder %s15_s7, %s68_s15  ;;  %p74_p5 = scmp.lt.s32.totalorder %s68_s15, %s68_s15 }
   0xb   :  { %p75_p6 = por %p74_p5, %p73_p4 }
   0xd   :  { %p76_p7 = pnand %p75_p6, %p69_p3 }
   0xf   :  { %79 = shalt.err (!%p76_p7)
}
  0x10   :  { %17 = dma.hbm_to_vmem [thread:$0]  %s142_s0, 256, %s15_s7, [#allocation3]  }
  0x11   :  { %102 = dma.done.wait [#allocation3], 256  }
  0x12   :  { %103 = vsyncadd [#allocation3], 4294967040  ;;  %v21_v0 = vld [vmem:[#allocation2] sm:$0xff]  ;;  %v22_v1 = vld [vmem:[#allocation2 + $0x8] sm:$0xff]  ;;  %s107_s18 = smov [#allocation5]  }
  0x13   :  { %v50_v2 = vadd.f32 -0.707107, %v21_v0  ;;  %v51_v3 = vadd.f32 -0.707107, %v22_v1  ;;  %s41_s19 = sshll.u32 %s107_s18, 4  ;;  %s42_s19 = int_to_ptr.vmem [resolvable:$true] %s41_s19 }
  0x14   :  { %s80_s0 = scalar_lea.vmem %s42_s19, 256  ;;  %p85_p9 = scmp.lt.s32.totalorder %s42_s19, %s42_s19 }
  0x15   :  { %v25_v4 = vmul.f32 2.5066264, %v50_v2  ;;  %v26_v5 = vmul.f32 2.5066264, %v51_v3  ;;  %p81_p8 = scmp.ne.s32.totalorder %s42_s19, %s80_s0  ;;  %p86_p10 = scmp.lt.s32.totalorder %s80_s0, %s80_s0 }
  0x17   :  { %54 = verf.f32 %v25_v4  ;;  %p87_p11 = por %p86_p10, %p85_p9 }
  0x18   :  { %56 = verf.f32 %v26_v5 }
  0x19   :  { %p88_p12 = pnand %p87_p11, %p81_p8 }
  0x21   :  { %v55_v6 = vpop.eup %54 }
  0x22   :  { %v57_v7 = vpop.eup %56  ;;  %v29_v8 = vadd.f32 1.0, %v55_v6 }
  0x23   :  { %v30_v9 = vadd.f32 1.0, %v57_v7 }
  0x24   :  { %v31_v10 = vmul.f32 0.5, %v29_v8 }
  0x25   :  { %v32_v11 = vmul.f32 0.5, %v30_v9 }
  0x26   :  { %33 = vst [vmem:[#allocation5] sm:$0xff] %v31_v10 }
  0x27   :  { %34 = vst [vmem:[#allocation5 + $0x8] sm:$0xff] %v32_v11 }
  0x28   :  { %91 = shalt.err (!%p88_p12)
}
  0x29   :  { %s92_s22 = scalar_lea.hbm %s143_s1, 256 }
  0x2a   :  { %p93_p13 = scmp.ne.s32.totalorder %s143_s1, %s92_s22  ;;  %p96_p0 = scmp.lt.u32.totalorder %s92_s22, %s143_s1 }
  0x2c   :  { %p98_p1 = pnand %p96_p0, %p93_p13 }
  0x2e   :  { %101 = shalt.err (!%p98_p1)
}
  0x2f   :  { %44 = dma.vmem_to_hbm [thread:$0]  %s42_s19, 256, %s143_s1, [#allocation4]  }
  0x30   :  { %104 = dma.done.wait [#allocation4], 256  }
  0x31   :  { %105 = vsyncadd [#allocation4], 4294967040 }
  0x32   :  { %48 = vsyncpa [#allocation3], 1 }
  0x33   :  { %49 = vsyncpa [#allocation4], 1 }

</bundles_post_ra>
